<compile_context>
chip_gen: v7x
topology: tpu7x:2x2x1
jax: 0.10.0
libtpu: 0.0.40
codegen_flags: <defaults>
</compile_context>

<pallas_src>
import jax
import jax.numpy as jnp
from jax.experimental import pallas as pl
from jax.experimental.pallas import tpu as pltpu


def _leaky(v, slope):
    return jnp.where(v >= 0.0, v, slope * v)


def _retouch_kernel(x_ref, c0_ref, c1_ref, w0_ref, w1_ref, o_ref):
    """Fused RetouchBlock forward for one batch element (channel-major layout).

    x_ref : (1, in_nc, HW)    f32  image: channels on sublanes, pixels on lanes
    c0_ref: (1, base_nf, 3)   f32  stage-0 conditioning [alpha0_0, alpha0_1, brightness0]
    c1_ref: (1, out_nc, 3)    f32  stage-1 conditioning [alpha1_0, alpha1_1, brightness1]
    w0_ref: (base_nf, in_nc)  f32  conv0 1x1 weight
    w1_ref: (out_nc, base_nf) f32  conv1 1x1 weight
    o_ref : (1, out_nc, HW)   f32
    """
    f32 = jnp.float32

    x = x_ref[0]      # (in_nc, HW)
    c0 = c0_ref[0]    # (base_nf, 3)
    c1 = c1_ref[0]    # (out_nc, 3)

    def contrast_adjust(feat, cond_cols):
        # ContrastAdjustment(feat, a0, a1, mean(feat)) + brightness, fused:
        #   where(shift >= 0, a0, a1) * shift + (mid + brightness)
        a0 = cond_cols[:, 0:1]      # (C, 1)
        a1 = cond_cols[:, 1:2]      # (C, 1)
        br = cond_cols[:, 2:3]      # (C, 1)
        mid = jnp.mean(feat, axis=1, keepdims=True)   # (C, 1) per-channel spatial mean
        shift = feat - mid
        return jnp.where(shift >= 0.0, a0, a1) * shift + (mid + br)

    # stage 0: 1x1 conv as (base_nf, in_nc) @ (in_nc, HW), f32 accumulate
    h0 = jnp.dot(w0_ref[...], x, preferred_element_type=f32)     # (base_nf, HW)
    h0 = contrast_adjust(h0, c0)

    # stage 1: 1x1 conv as (out_nc, base_nf) @ (base_nf, HW)
    h1 = jnp.dot(w1_ref[...], h0, preferred_element_type=f32)    # (out_nc, HW)
    h1 = contrast_adjust(h1, c1)

    o_ref[0] = h1.astype(o_ref.dtype)   # lane-dense store (last dim = HW = 256)


def retouch_block_forward(x_nchw, cond, params):
    """RetouchBlock forward. x_nchw: (N, in_nc, H, W) f32, cond: (N, cond_nf) f32."""
    w0, w1, at_stack, bt0_stack, bt1_stack = params
    N, in_nc, H, W = x_nchw.shape
    HW = H * W
    base_nf = w0.shape[0]
    out_nc = w1.shape[0]

    # ---- Conditioning MLPs hoisted into plain JAX (batched over N and the 6 heads). ----
    # at_stack : (6, nhidden, cond_nf), order [s0_0, s0_1, b0, s1_0, s1_1, b1]
    # bt0_stack: (3, base_nf, nhidden), bt1_stack: (3, out_nc, nhidden)
    h = _leaky(jnp.einsum("nc,khc->nkh", cond, at_stack), 0.1)      # (N, 6, nhidden)
    s0 = jnp.einsum("nkh,kch->nkc", h[:, 0:3], bt0_stack)           # (N, 3, base_nf)
    s1 = jnp.einsum("nkh,kch->nkc", h[:, 3:6], bt1_stack)           # (N, 3, out_nc)

    cond0 = jnp.stack(
        [_leaky(1.0 + s0[:, 0], 0.02), _leaky(1.0 + s0[:, 1], 0.02), s0[:, 2]],
        axis=-1)                                                    # (N, base_nf, 3)
    cond1 = jnp.stack(
        [_leaky(1.0 + s1[:, 0], 0.02), _leaky(1.0 + s1[:, 1], 0.02), s1[:, 2]],
        axis=-1)                                                    # (N, out_nc, 3)

    x3 = x_nchw.reshape(N, in_nc, HW)   # pure reshape: channel-major, lane-dense

    out3 = pl.pallas_call(
        _retouch_kernel,
        out_shape=jax.ShapeDtypeStruct((N, out_nc, HW), x_nchw.dtype),
        grid=(N,),
        in_specs=[
            pl.BlockSpec((1, in_nc, HW), lambda n: (n, 0, 0)),
            pl.BlockSpec((1, base_nf, 3), lambda n: (n, 0, 0)),
            pl.BlockSpec((1, out_nc, 3), lambda n: (n, 0, 0)),
            pl.BlockSpec((base_nf, in_nc), lambda n: (0, 0)),
            pl.BlockSpec((out_nc, base_nf), lambda n: (0, 0)),
        ],
        out_specs=pl.BlockSpec((1, out_nc, HW), lambda n: (n, 0, 0)),
        compiler_params=pltpu.CompilerParams(
            dimension_semantics=("parallel",)),   # v7x: one image per TensorCore
    )(x3, cond0, cond1, w0, w1)
    return out3.reshape(N, out_nc, H, W)


def init_retouch_params(key, in_nc, out_nc, base_nf=64, cond_nf=64, nhidden=64):
    """Deterministic synthetic parameters (PyTorch (out_features, in_features) layout)."""
    keys = jax.random.split(key, 14)

    def lin(k, cout, cin):
        scale = (1.0 / cin) ** 0.5
        return (scale * jax.random.normal(k, (cout, cin))).astype(jnp.float32)

    w0 = lin(keys[0], base_nf, in_nc)     # conv0 1x1, no bias
    w1 = lin(keys[1], out_nc, base_nf)    # conv1 1x1, no bias
    # cond MLP order: [scale0_0, scale0_1, brightness0, scale1_0, scale1_1, brightness1]
    at = jnp.stack([lin(keys[2 + i], nhidden, cond_nf) for i in range(6)])     # (6, nh, cond_nf)
    bt0 = jnp.stack([lin(keys[8 + i], base_nf, nhidden) for i in range(3)])    # (3, base_nf, nh)
    bt1 = jnp.stack([lin(keys[11 + i], out_nc, nhidden) for i in range(3)])    # (3, out_nc, nh)
    return (w0, w1, at, bt0, bt1)


def retouch_reference(x, cond, params):
    """Pure-JAX reference matching the PyTorch module (f32 math, same weights)."""
    w0, w1, at, bt0, bt1 = params

    def mlp(a, b):                          # a: (nh, cond_nf), b: (C, nh)
        h = _leaky(cond @ a.T, 0.1)         # (N, nh)
        return h @ b.T                      # (N, C)

    s00, s01, b0 = mlp(at[0], bt0[0]), mlp(at[1], bt0[1]), mlp(at[2], bt0[2])
    s10, s11, b1 = mlp(at[3], bt1[0]), mlp(at[4], bt1[1]), mlp(at[5], bt1[2])

    def exp4(v):
        return v[:, :, None, None]

    a00, a01 = exp4(_leaky(1.0 + s00, 0.02)), exp4(_leaky(1.0 + s01, 0.02))
    a10, a11 = exp4(_leaky(1.0 + s10, 0.02)), exp4(_leaky(1.0 + s11, 0.02))
    b0, b1 = exp4(b0), exp4(b1)

    out = jnp.einsum("oc,nchw->nohw", w0, x)
    mid0 = out.mean(axis=(2, 3), keepdims=True)
    sh = out - mid0
    out = a00 * jnp.maximum(sh, 0.0) + a01 * jnp.minimum(sh, 0.0) + mid0 + b0

    out = jnp.einsum("oc,nchw->nohw", w1, out)
    mid1 = out.mean(axis=(2, 3), keepdims=True)
    sh = out - mid1
    out = a10 * jnp.maximum(sh, 0.0) + a11 * jnp.minimum(sh, 0.0) + mid1 + b1
    return out


if __name__ == "__main__":
    key = jax.random.PRNGKey(0)
    kx, kc, kp = jax.random.split(key, 3)

    # Small shapes consistent with the module: batch=2, in_nc=out_nc=4, 16x16 spatial,
    # base_nf=64, cond_nf=64, nhidden=64, kernel_sizes=1.
    N, in_nc, out_nc, H, W = 2, 4, 4, 16, 16
    base_nf, cond_nf, nhidden = 64, 64, 64

    x = jax.random.normal(kx, (N, in_nc, H, W), dtype=jnp.float32)
    cond = jax.random.normal(kc, (N, cond_nf), dtype=jnp.float32)
    params = init_retouch_params(kp, in_nc, out_nc, base_nf, cond_nf, nhidden)

    out = retouch_block_forward(x, cond, params)
    out = jax.block_until_ready(out)

    assert out.shape == (N, out_nc, H, W), out.shape
    assert out.dtype == jnp.float32

    # Full-f32 kernel math -> tight tolerance.
    ref = retouch_reference(x, cond, params)
    max_err = float(jnp.max(jnp.abs(out - ref)))
    assert jnp.allclose(out, ref, rtol=1e-3, atol=1e-3), f"max_err={max_err}"

    print("KERNEL_OK")
</pallas_src>

<mosaic_0001>
module attributes {stable_mosaic.version = 11 : i64} {
  func.func @_retouch_kernel(%arg0: i32, %arg1: memref<1x4x256xf32, #tpu.memory_space<vmem>>, %arg2: memref<1x64x3xf32, #tpu.memory_space<vmem>>, %arg3: memref<1x4x3xf32, #tpu.memory_space<vmem>>, %arg4: memref<64x4xf32, #tpu.memory_space<vmem>>, %arg5: memref<4x64xf32, #tpu.memory_space<vmem>>, %arg6: memref<1x4x256xf32, #tpu.memory_space<vmem>>) attributes {dimension_semantics = [#tpu.dimension_semantics<parallel>], iteration_bounds = array<i64: 2>, scalar_prefetch = 0 : i64, scratch_operands = 0 : i64, tpu.core_type = #tpu.core_type<tc>, window_params = [{transform_indices = @transform_0, window_bounds = array<i64: 1, 4, 256>}, {transform_indices = @transform_1, window_bounds = array<i64: 1, 64, 3>}, {transform_indices = @transform_2, window_bounds = array<i64: 1, 4, 3>}, {pipeline_mode = #tpu.pipeline_mode<synchronous>, transform_indices = @transform_3, window_bounds = array<i64: 64, 4>}, {pipeline_mode = #tpu.pipeline_mode<synchronous>, transform_indices = @transform_4, window_bounds = array<i64: 4, 64>}, {transform_indices = @transform_5, window_bounds = array<i64: 1, 4, 256>}]} {
    %c0 = arith.constant 0 : index
    %c0_0 = arith.constant 0 : index
    %c0_1 = arith.constant 0 : index
    %0 = vector.load %arg1[%c0, %c0_0, %c0_1] : memref<1x4x256xf32, #tpu.memory_space<vmem>>, vector<1x4x256xf32>
    %1 = vector.shape_cast %0 : vector<1x4x256xf32> to vector<4x256xf32>
    %c0_2 = arith.constant 0 : index
    %c0_3 = arith.constant 0 : index
    %c0_4 = arith.constant 0 : index
    %2 = vector.load %arg2[%c0_2, %c0_3, %c0_4] : memref<1x64x3xf32, #tpu.memory_space<vmem>>, vector<1x64x3xf32>
    %3 = vector.shape_cast %2 : vector<1x64x3xf32> to vector<64x3xf32>
    %c0_5 = arith.constant 0 : index
    %c0_6 = arith.constant 0 : index
    %c0_7 = arith.constant 0 : index
    %4 = vector.load %arg3[%c0_5, %c0_6, %c0_7] : memref<1x4x3xf32, #tpu.memory_space<vmem>>, vector<1x4x3xf32>
    %5 = vector.shape_cast %4 : vector<1x4x3xf32> to vector<4x3xf32>
    %c0_8 = arith.constant 0 : index
    %c0_9 = arith.constant 0 : index
    %6 = vector.load %arg4[%c0_8, %c0_9] : memref<64x4xf32, #tpu.memory_space<vmem>>, vector<64x4xf32>
    %cst = arith.constant dense<0.000000e+00> : vector<64x256xf32>
    %7 = tpu.matmul %6, %1, %cst {dimension_numbers = #tpu.dot_dimension_numbers<[1], [0], [0], [1], [0, 0, 1, 1], [], []>} : vector<64x4xf32>, vector<4x256xf32>, vector<64x256xf32> -> vector<64x256xf32>
    %8 = vector.extract_strided_slice %3 {offsets = [0, 0], sizes = [64, 1], strides = [1, 1]} : vector<64x3xf32> to vector<64x1xf32>
    %9 = vector.extract_strided_slice %3 {offsets = [0, 1], sizes = [64, 1], strides = [1, 1]} : vector<64x3xf32> to vector<64x1xf32>
    %10 = vector.extract_strided_slice %3 {offsets = [0, 2], sizes = [64, 1], strides = [1, 1]} : vector<64x3xf32> to vector<64x1xf32>
    %cst_10 = arith.constant dense<0.000000e+00> : vector<64xf32>
    %11 = vector.multi_reduction <add>, %7, %cst_10 [1] : vector<64x256xf32> to vector<64xf32>
    %12 = vector.shape_cast %11 : vector<64xf32> to vector<64x1xf32>
    %cst_11 = arith.constant 2.560000e+02 : f32
    %13 = vector.broadcast %cst_11 : f32 to vector<64x1xf32>
    %14 = arith.divf %12, %13 : vector<64x1xf32>
    %15 = vector.broadcast %14 : vector<64x1xf32> to vector<64x256xf32>
    %16 = arith.subf %7, %15 : vector<64x256xf32>
    %cst_12 = arith.constant 0.000000e+00 : f32
    %17 = vector.broadcast %cst_12 : f32 to vector<64x256xf32>
    %18 = arith.cmpf oge, %16, %17 : vector<64x256xf32>
    %19 = vector.shape_cast %8 : vector<64x1xf32> to vector<64x1xf32>
    %20 = vector.broadcast %19 : vector<64x1xf32> to vector<64x256xf32>
    %21 = vector.shape_cast %9 : vector<64x1xf32> to vector<64x1xf32>
    %22 = vector.broadcast %21 : vector<64x1xf32> to vector<64x256xf32>
    %23 = arith.select %18, %20, %22 : vector<64x256xi1>, vector<64x256xf32>
    %24 = arith.mulf %23, %16 : vector<64x256xf32>
    %25 = arith.addf %14, %10 : vector<64x1xf32>
    %26 = vector.broadcast %25 : vector<64x1xf32> to vector<64x256xf32>
    %27 = arith.addf %24, %26 : vector<64x256xf32>
    %c0_13 = arith.constant 0 : index
    %c0_14 = arith.constant 0 : index
    %28 = vector.load %arg5[%c0_13, %c0_14] : memref<4x64xf32, #tpu.memory_space<vmem>>, vector<4x64xf32>
    %cst_15 = arith.constant dense<0.000000e+00> : vector<4x256xf32>
    %29 = tpu.matmul %28, %27, %cst_15 {dimension_numbers = #tpu.dot_dimension_numbers<[1], [0], [0], [1], [0, 0, 1, 1], [], []>} : vector<4x64xf32>, vector<64x256xf32>, vector<4x256xf32> -> vector<4x256xf32>
    %30 = vector.extract_strided_slice %5 {offsets = [0, 0], sizes = [4, 1], strides = [1, 1]} : vector<4x3xf32> to vector<4x1xf32>
    %31 = vector.extract_strided_slice %5 {offsets = [0, 1], sizes = [4, 1], strides = [1, 1]} : vector<4x3xf32> to vector<4x1xf32>
    %32 = vector.extract_strided_slice %5 {offsets = [0, 2], sizes = [4, 1], strides = [1, 1]} : vector<4x3xf32> to vector<4x1xf32>
    %cst_16 = arith.constant dense<0.000000e+00> : vector<4xf32>
    %33 = vector.multi_reduction <add>, %29, %cst_16 [1] : vector<4x256xf32> to vector<4xf32>
    %34 = vector.shape_cast %33 : vector<4xf32> to vector<4x1xf32>
    %cst_17 = arith.constant 2.560000e+02 : f32
    %35 = vector.broadcast %cst_17 : f32 to vector<4x1xf32>
    %36 = arith.divf %34, %35 : vector<4x1xf32>
    %37 = vector.broadcast %36 : vector<4x1xf32> to vector<4x256xf32>
    %38 = arith.subf %29, %37 : vector<4x256xf32>
    %cst_18 = arith.constant 0.000000e+00 : f32
    %39 = vector.broadcast %cst_18 : f32 to vector<4x256xf32>
    %40 = arith.cmpf oge, %38, %39 : vector<4x256xf32>
    %41 = vector.shape_cast %30 : vector<4x1xf32> to vector<4x1xf32>
    %42 = vector.broadcast %41 : vector<4x1xf32> to vector<4x256xf32>
    %43 = vector.shape_cast %31 : vector<4x1xf32> to vector<4x1xf32>
    %44 = vector.broadcast %43 : vector<4x1xf32> to vector<4x256xf32>
    %45 = arith.select %40, %42, %44 : vector<4x256xi1>, vector<4x256xf32>
    %46 = arith.mulf %45, %38 : vector<4x256xf32>
    %47 = arith.addf %36, %32 : vector<4x1xf32>
    %48 = vector.broadcast %47 : vector<4x1xf32> to vector<4x256xf32>
    %49 = arith.addf %46, %48 : vector<4x256xf32>
    %c0_19 = arith.constant 0 : index
    %c0_20 = arith.constant 0 : index
    %c0_21 = arith.constant 0 : index
    %50 = vector.load %arg6[%c0_19, %c0_20, %c0_21] : memref<1x4x256xf32, #tpu.memory_space<vmem>>, vector<1x4x256xf32>
    %51 = vector.shape_cast %50 : vector<1x4x256xf32> to vector<4x256xf32>
    %52 = vector.shape_cast %49 : vector<4x256xf32> to vector<1x4x256xf32>
    tpu.vector_store %arg6[%c0_19, %c0_20, %c0_21], %52 {strides = array<i32>} : memref<1x4x256xf32, #tpu.memory_space<vmem>>, vector<1x4x256xf32>,
    return
  }
  func.func @transform_0(%arg0: i32) -> (i32, i32, i32) {
    %c0_i32 = arith.constant 0 : i32
    %c0_i32_0 = arith.constant 0 : i32
    %c0_i32_1 = arith.constant 0 : i32
    return %arg0, %c0_i32, %c0_i32_0 : i32, i32, i32
  }
  func.func @transform_1(%arg0: i32) -> (i32, i32, i32) {
    %c0_i32 = arith.constant 0 : i32
    %c0_i32_0 = arith.constant 0 : i32
    %c0_i32_1 = arith.constant 0 : i32
    return %arg0, %c0_i32, %c0_i32_0 : i32, i32, i32
  }
  func.func @transform_2(%arg0: i32) -> (i32, i32, i32) {
    %c0_i32 = arith.constant 0 : i32
    %c0_i32_0 = arith.constant 0 : i32
    %c0_i32_1 = arith.constant 0 : i32
    return %arg0, %c0_i32, %c0_i32_0 : i32, i32, i32
  }
  func.func @transform_3(%arg0: i32) -> (i32, i32) {
    %c0_i32 = arith.constant 0 : i32
    %c0_i32_0 = arith.constant 0 : i32
    %c0_i32_1 = arith.constant 0 : i32
    return %c0_i32, %c0_i32_0 : i32, i32
  }
  func.func @transform_4(%arg0: i32) -> (i32, i32) {
    %c0_i32 = arith.constant 0 : i32
    %c0_i32_0 = arith.constant 0 : i32
    %c0_i32_1 = arith.constant 0 : i32
    return %c0_i32, %c0_i32_0 : i32, i32
  }
  func.func @transform_5(%arg0: i32) -> (i32, i32, i32) {
    %c0_i32 = arith.constant 0 : i32
    %c0_i32_0 = arith.constant 0 : i32
    %c0_i32_1 = arith.constant 0 : i32
    return %arg0, %c0_i32, %c0_i32_0 : i32, i32, i32
  }
}

</mosaic_0001>

<bundles_post_ra>
// kernel: tpu_custom_call.1
= control target key start
LH: loop header
LB: loop body
LE: loop exit
PB: predicated region body
PF: predicated region fallthrough
CT: control target
= control target key end

     0   :  { %10 = vsyncpa [#allocation3], 0  ;;  %s1379_s0 = inlined_call_operand.vmem [shape: f32[2,4,256], index: 0, kind: input, shape index: {}]   ;;  %s1380_s1 = inlined_call_operand.vmem [shape: f32[2,64,3], index: 1, kind: input, shape index: {}]   ;;  %s1381_s2 = inlined_call_operand.vmem [shape: f32[2,4,3], index: 2, kind: input, shape index: {}]   ;;  %s1382_s3 = inlined_call_operand.vmem [shape: f32[64,4], index: 3, kind: input, shape index: {}]   ;;  %s1383_s4 = inlined_call_operand.vmem [shape: f32[4,64], index: 4, kind: input, shape index: {}]   ;;  %s1384_s5 = inlined_call_operand.hbm [shape: f32[2,4,256], index: 5, kind: output, shape index: {}]  }
   0x1   :  { %12 = vsyncpa [#allocation3 + $0x1], 0  ;;  %s1069_s18 = smov 0   ;;  %s1071_s19 = smov 0  }
   0x2   :  { %s1073_s20 = smov 0   ;;  %s1075_s21 = smov 0  }
   0x3 LB: > { %s1090_s22 = sadd.s32 4294967295, %s1032_s21   ;;  %s866_s23 = sadd.s32 4294967294, %s1032_s21   ;;  %s1032_s21 = sphi %s1075_s21, %s1390_s21   ;;  %s1028_s20 = sphi %s1073_s20, %s1389_s20   ;;  %s1024_s19 = sphi %s1071_s19, %s1388_s19   ;;  %s1020_s18 = sphi %s1069_s18, %s1387_s18  }
   0x4   : > { %s1094_s24 = sadd.s32 1, %s1032_s21   ;;  %s145_s25 = sadd.s32 1, %s1028_s20 }
   0x5   : > { %s142_s26 = ssub.s32 %s1032_s21, %s1094_s24  ;;  %p155_p0 = scmp.ne.s32.totalorder %s1028_s20, %s1024_s19 }
   0x6   : > { %p143_p1 = scmp.eq.s32.totalorder %s142_s26, 0  ;;  %p156_p2 = scmp.eq.s32.totalorder %s1090_s22, 1 }
   0x7   : > { %p161_p3 = scmp.ne.s32.totalorder %s1024_s19, %s1020_s18  ;;  %p162_p4 = scmp.eq.s32.totalorder %s866_s23, 1 }
   0x8   : > { %s1105_s27 = scalar_select %p143_p1, %s1028_s20, %s145_s25  }
   0x9   : > { %p1107_p5 = por %p156_p2, %p155_p0  ;;  %p1111_p6 = por %p162_p4, %p161_p3 }
   0xa   : > { %p869_p7 = scmp.ge.s32.totalorder %s1032_s21, 1  ;;  %p209_p8 = scmp.lt.s32.totalorder %s1032_s21, 3 }
   0xc   : > { %p210_p9 = pnand %p869_p7, %p209_p8 }
   0xd   : > { %p246_p10 = scmp.lt.s32.totalorder (!%p210_p9), %s1090_s22, 1  ;;  %v1034_v0 = vmov (!%p210_p9), 0.0   ;;  %vm305_vm0 = vcmask (!%p210_p9), 1043456   ;;  %v270_v3 = vld [vmem:[%s1382_s3] sm:$0xff] (!%p210_p9)  ;;  %vm280_vm1 = vcmask (!%p210_p9), 31744   ;;  %v271_v4 = vld [vmem:[%s1382_s3 + $0x8] sm:$0xff] (!%p210_p9) }
   0xe   : > { %213 = sbr.rel (%p210_p9) target bundleno = 1136 (0x470), region = 40  ;;  %374 = vmatprep.mubr.f32.mxu0 (!%p210_p9), %v1034_v0  ;;  %725 = vmatprep.mubr.f32.mxu1 (!%p210_p9), %v1034_v0  ;;  %v272_v5 = vld [vmem:[%s1382_s3 + $0x10] sm:$0xff] (!%p210_p9)  ;;  %v273_v6 = vld [vmem:[%s1382_s3 + $0x18] sm:$0xff] (!%p210_p9)  ;;  %v274_v7 = vld [vmem:[%s1382_s3 + $0x20] sm:$0xff] (!%p210_p9)  ;;  %v1035_v11 = vmov (!%p210_p9), 0   ;;  %v1036_v38 = vmov (!%p210_p9), 1  }
   0xf   : > { %v275_v8 = vld [vmem:[%s1382_s3 + $0x28] sm:$0xff] (!%p210_p9)  ;;  %v276_v9 = vld [vmem:[%s1382_s3 + $0x30] sm:$0xff] (!%p210_p9)  ;;  %v277_v10 = vld [vmem:[%s1382_s3 + $0x38] sm:$0xff] (!%p210_p9)  ;;  %955 = vset.pattern.permute.xlu1 (!%p210_p9), %v1035_v11  ;;  %954 = vset.pattern.permute.xlu0 (!%p210_p9), %v1035_v11  ;;  %v1037_v45 = vmov (!%p210_p9), 2   ;;  %s894_s7 = sshll.u32 (!%p210_p9), %s1090_s22, 7 }
  0x10   : > { %s1337_s12 = scalar_lea.hbm (!%p210_p9), %s1384_s5, %s894_s7 }
  0x15   : > { %s1119_s30 = scalar_select %p246_p10, %s1090_s22, 1 }
  0x16   : > { %s1038_s22 = smov [#allocation2]  }
  0x17   : > { %s892_s6 = sshll.u32 %s1119_s30, 3  ;;  %s893_s11 = sshll.u32 %s1119_s30, 6 }
  0x18   : > { %s250_s9 = scalar_lea.vmem %s1379_s0, %s892_s6  ;;  %s255_s14 = scalar_lea.vmem %s1380_s1, %s893_s11 }
  0x19   : > { %v260_v1 = vld [vmem:[%s250_s9] sm:$0xff]  ;;  %v262_v36 = vld [vmem:[%s255_s14 + $0x8] sm:$0xff]  ;;  %v263_v40 = vld [vmem:[%s255_s14 + $0x10] sm:$0xff]  ;;  %s875_s17 = sshll.u32 %s1119_s30, 2  ;;  %s243_s30 = sand.u32 1, %s1024_s19  }
  0x1a   : > { %v279_v2 = vcombine.high %v260_v1, %v260_v1  ;;  %v261_v37 = vld [vmem:[%s255_s14] sm:$0xff]  ;;  %v267_v41 = vld [vmem:[%s255_s14 + $0x30] sm:$0xff]  ;;  %v264_v42 = vld [vmem:[%s255_s14 + $0x18] sm:$0xff]  ;;  %s259_s26 = scalar_lea.vmem %s1381_s2, %s875_s17  ;;  %s870_s6 = sshll.u32 %s243_s30, 3 }
  0x1b   : > { %v265_v39 = vld [vmem:[%s255_s14 + $0x20] sm:$0xff]  ;;  %v266_v43 = vld [vmem:[%s255_s14 + $0x28] sm:$0xff]  ;;  %v1218_v44 = vld [vmem:[%s255_s14 + $0x38] sm:$0xff]  ;;  %s245_s8 = scalar_lea.vmem [#allocation2], %s870_s6  ;;  %s769_s13 = scalar_lea.sflag [#allocation3], %s243_s30 }
  0x1c   : > { %876 = vmatprep.subr.msk.mxu0 %vm305_vm0, %v279_v2  ;;  %s783_s9 = sshll.u32 %s245_s8, 4  ;;  %s974_s15 = sshll.u32 %s1038_s22, 4  ;;  %s1339_s9 = int_to_ptr.vmem [resolvable:$true] %s783_s9  ;;  %s975_s15 = int_to_ptr.vmem [resolvable:$false] %s974_s15 }
  0x1d   : > { %877 = vmatpush1.msk.msra.mxu0 %vm305_vm0, %v260_v1  ;;  %s970_s14 = scalar_lea.vmem %s1339_s9, 128  ;;  %s976_s16 = scalar_lea.vmem %s975_s15, 256 }
  0x1e   : > { %878 = vmatmul.mubr.msk.f32.vlgmr.msra.gmra.mrb[0].mxu0 %vm280_vm1, %v270_v3  ;;  %p971_p11 = scmp.ne.s32.totalorder %s1339_s9, %s970_s14  ;;  %p977_p0 = scmp.lt.s32.totalorder %s1339_s9, %s975_s15 }
  0x1f   : > { %380 = vmatprep.mubr.f32.mxu0 %v1034_v0  ;;  %p978_p1 = scmp.lt.s32.totalorder %s976_s16, %s970_s14 }
  0x20   : > { %p972_p12 = pnand %p971_p11, %p1107_p5 }
  0x21   : > { %p979_p2 = por %p978_p1, %p977_p0 }
  0x22   : > { %879 = vmatmul.mubr.msk.f32.gmra.mrb[2].mxu0 %vm280_vm1, %v271_v4  ;;  %p973_p13 = pneg %p972_p12 }
  0x23   : > { %386 = vmatprep.mubr.f32.mxu0 %v1034_v0 }
  0x24   : > { %p980_p3 = pnand %p979_p2, %p973_p13 }
  0x26   : > { %880 = vmatmul.mubr.msk.f32.gmra.mrb[4].mxu0 %vm280_vm1, %v272_v5 }
  0x27   : > { %392 = vmatprep.mubr.f32.mxu0 %v1034_v0 }
  0x2a   : > { %881 = vmatmul.mubr.msk.f32.gmra.mrb[6].mxu0 %vm280_vm1, %v273_v6 }
  0x2b   : > { %398 = vmatprep.mubr.f32.mxu0 %v1034_v0 }
  0x2e   : > { %882 = vmatmul.mubr.msk.f32.gmra.mrb[8].mxu0 %vm280_vm1, %v274_v7 }
  0x2f   : > { %404 = vmatprep.mubr.f32.mxu0 %v1034_v0 }
  0x32   : > { %883 = vmatmul.mubr.msk.f32.gmra.mrb[10].mxu0 %vm280_vm1, %v275_v8 }
  0x33   : > { %410 = vmatprep.mubr.f32.mxu0 %v1034_v0 }
  0x36   : > { %884 = vmatmul.mubr.msk.f32.gmra.mrb[12].mxu0 %vm280_vm1, %v276_v9 }
  0x37   : > { %416 = vmatprep.mubr.f32.mxu0 %v1034_v0 }
  0x3a   : > { %885 = vmatmul.mubr.msk.f32.gmra.mrb[14].mxu0 %vm280_vm1, %v277_v10 }
  0xf1   : > { %v1161_v12 = vpop.f32.mrb[0].mxu0 }
  0xf2   : > { %v1163_v13 = vpop.f32.mrb[1].mxu0 }
  0xf3   : > { %v423_v14 = vadd.f32 %v1163_v13, %v1161_v12 }
  0xf5   : > { %424 = vadd.xlane.f32.xlu0 %v423_v14  ;;  %v1167_v15 = vpop.f32.mrb[2].mxu0 }
  0xf6   : > { %v1169_v16 = vpop.f32.mrb[3].mxu0 }
  0xf7   : > { %v426_v17 = vadd.f32 %v1169_v16, %v1167_v15 }
  0xf9   : > { %427 = vadd.xlane.f32.xlu0 %v426_v17  ;;  %v1173_v18 = vpop.f32.mrb[4].mxu0 }
  0xfa   : > { %v1175_v19 = vpop.f32.mrb[5].mxu0 }
  0xfb   : > { %v429_v20 = vadd.f32 %v1175_v19, %v1173_v18 }
  0xfd   : > { %430 = vadd.xlane.f32.xlu1 %v429_v20  ;;  %v1179_v21 = vpop.f32.mrb[6].mxu0 }
  0xfe   : > { %v1181_v22 = vpop.f32.mrb[7].mxu0 }
  0xff   : > { %v432_v23 = vadd.f32 %v1181_v22, %v1179_v21 }
 0x101   : > { %433 = vadd.xlane.f32.xlu1 %v432_v23  ;;  %v1185_v24 = vpop.f32.mrb[8].mxu0 }
 0x102   : > { %v1187_v25 = vpop.f32.mrb[9].mxu0 }
 0x103   : > { %v435_v26 = vadd.f32 %v1187_v25, %v1185_v24 }
 0x105   : > { %436 = vadd.xlane.f32.xlu0 %v435_v26  ;;  %v1191_v27 = vpop.f32.mrb[10].mxu0 }
 0x106   : > { %v1193_v28 = vpop.f32.mrb[11].mxu0 }
 0x107   : > { %v438_v29 = vadd.f32 %v1193_v28, %v1191_v27 }
 0x109   : > { %439 = vadd.xlane.f32.xlu1 %v438_v29  ;;  %v1197_v30 = vpop.f32.mrb[12].mxu0 }
 0x10a   : > { %v1199_v31 = vpop.f32.mrb[13].mxu0 }
 0x10b   : > { %v441_v32 = vadd.f32 %v1199_v31, %v1197_v30 }
 0x10d   : > { %442 = vadd.xlane.f32.xlu0 %v441_v32  ;;  %v1203_v33 = vpop.f32.mrb[14].mxu0 }
 0x10e   : > { %v1205_v34 = vpop.f32.mrb[15].mxu0 }
 0x10f   : > { %v444_v35 = vadd.f32 %v1205_v34, %v1203_v33 }
 0x11a   : > { %495 = vperm.xlu1 %955, %v262_v36  }
 0x11e   : > { %956 = vset.pattern.permute.xlu1 %v1036_v38 }
 0x11f   : > { %529 = vperm.xlu1 %956, %v261_v37  }
 0x123   : > { %533 = vperm.xlu1 %956, %v262_v36   ;;  %490 = vperm.xlu0 %954, %v261_v37  }
 0x127   : > { %957 = vset.pattern.permute.xlu1 %v1035_v11  ;;  %510 = vperm.xlu0 %954, %v265_v39  }
 0x128   : > { %500 = vperm.xlu1 %957, %v263_v40  }
 0x12b   : > { %520 = vperm.xlu0 %954, %v267_v41  }
 0x12c   : > { %505 = vperm.xlu1 %957, %v264_v42  }
 0x12f   : > { %961 = vset.pattern.permute.xlu0 %v1036_v38 }
 0x130   : > { %958 = vset.pattern.permute.xlu1 %v1036_v38  ;;  %541 = vperm.xlu0 %961, %v264_v42  }
 0x131   : > { %537 = vperm.xlu1 %958, %v263_v40  }
 0x134   : > { %549 = vperm.xlu0 %961, %v266_v43  }
 0x135   : > { %959 = vset.pattern.permute.xlu1 %v1035_v11 }
 0x136   : > { %515 = vperm.xlu1 %959, %v266_v43  }
 0x138   : > { %557 = vperm.xlu0 %961, %v1218_v44  }
 0x13a   : > { %960 = vset.pattern.permute.xlu1 %v1036_v38 }
 0x13c   : > { %968 = vset.pattern.permute.xlu0 %v1037_v45 }
 0x15a   : > { %445 = vadd.xlane.f32.xlu1 %v444_v35 }
 0x16b   : > { %545 = vperm.xlu1 %960, %v265_v39  }
 0x16f   : > { %962 = vset.pattern.permute.xlu1 %v1035_v11 }
 0x170   : > { %525 = vperm.xlu1 %962, %v1218_v44  }
 0x174   : > { %963 = vset.pattern.permute.xlu1 %v1036_v38 }
 0x175   : > { %553 = vperm.xlu1 %963, %v267_v41  }
 0x179   : > { %964 = vset.pattern.permute.xlu1 %v1037_v45 }
 0x182   : > { %v425_v46 = vpop.xlane.xlu0 %424 }
 0x183   : > { %v448_v47 = vmul.f32 0.00390625, %v425_v46 }
 0x185   : > { %v592_v48 = vadd.f32 %v448_v47, %v261_v37  ;;  %v1228_v49 = vsub.f32 %v1161_v12, %v448_v47  ;;  %v1231_v50 = vsub.f32 %v1163_v13, %v448_v47 }
 0x186   : > { %v428_v51 = vpop.xlane.xlu0 %427 }
 0x187   : > { %v449_v52 = vmul.f32 0.00390625, %v428_v51  ;;  %602 = vperm.xlu1 %964, %v592_v48   ;;  %vm472_vm8 = vcmp.ge.f32.partialorder %v1228_v49, 0.0  ;;  %vm473_vm9 = vcmp.ge.f32.partialorder %v1231_v50, 0.0 }
 0x189   : > { %v593_v53 = vadd.f32 %v449_v52, %v262_v36  ;;  %v1234_v54 = vsub.f32 %v1167_v15, %v449_v52  ;;  %v1237_v55 = vsub.f32 %v1169_v16, %v449_v52 }
 0x18a   : > { %v431_v56 = vpop.xlane.xlu1 %430 }
 0x18b   : > { %v450_v57 = vmul.f32 0.00390625, %v431_v56  ;;  %607 = vperm.xlu1 %964, %v593_v53   ;;  %vm474_vm6 = vcmp.ge.f32.partialorder %v1234_v54, 0.0  ;;  %vm475_vm7 = vcmp.ge.f32.partialorder %v1237_v55, 0.0 }
 0x18d   : > { %v594_v58 = vadd.f32 %v450_v57, %v263_v40  ;;  %v1240_v59 = vsub.f32 %v1173_v18, %v450_v57  ;;  %v1243_v60 = vsub.f32 %v1175_v19, %v450_v57 }
 0x18e   : > { %v434_v61 = vpop.xlane.xlu1 %433 }
 0x18f   : > { %v451_v62 = vmul.f32 0.00390625, %v434_v61  ;;  %612 = vperm.xlu1 %964, %v594_v58   ;;  %vm476_vm10 = vcmp.ge.f32.partialorder %v1240_v59, 0.0  ;;  %vm477_vm11 = vcmp.ge.f32.partialorder %v1243_v60, 0.0 }
 0x191   : > { %v595_v63 = vadd.f32 %v451_v62, %v264_v42  ;;  %v1246_v0 = vsub.f32 %v1179_v21, %v451_v62  ;;  %v1249_v1 = vsub.f32 %v1181_v22, %v451_v62 }
 0x192   : > { %v437_v2 = vpop.xlane.xlu0 %436 }
 0x193   : > { %v452_v3 = vmul.f32 0.00390625, %v437_v2  ;;  %617 = vperm.xlu1 %964, %v595_v63   ;;  %vm478_vm12 = vcmp.ge.f32.partialorder %v1246_v0, 0.0  ;;  %vm479_vm13 = vcmp.ge.f32.partialorder %v1249_v1, 0.0 }
 0x195   : > { %v596_v4 = vadd.f32 %v452_v3, %v265_v39  ;;  %v1252_v5 = vsub.f32 %v1185_v24, %v452_v3  ;;  %v1255_v6 = vsub.f32 %v1187_v25, %v452_v3 }
 0x196   : > { %v440_v7 = vpop.xlane.xlu1 %439 }
 0x197   : > { %v453_v8 = vmul.f32 0.00390625, %v440_v7  ;;  %622 = vperm.xlu1 %964, %v596_v4   ;;  %vm480_vm14 = vcmp.ge.f32.partialorder %v1252_v5, 0.0  ;;  %vm481_vm15 = vcmp.ge.f32.partialorder %v1255_v6, 0.0 }
 0x199   : > { %v597_v9 = vadd.f32 %v453_v8, %v266_v43  ;;  %v1258_v10 = vsub.f32 %v1191_v27, %v453_v8  ;;  %v1261_v12 = vsub.f32 %v1193_v28, %v453_v8 }
 0x19a   : > { %v443_v13 = vpop.xlane.xlu0 %442  ;;  %v496_v18 = vpop.permute.xlu1 %495 }
 0x19b   : > { %v454_v14 = vmul.f32 0.00390625, %v443_v13  ;;  %627 = vperm.xlu1 %964, %v597_v9   ;;  %vm482_vm1 = vcmp.ge.f32.partialorder %v1258_v10, 0.0 }
 0x19d   : > { %v598_v15 = vadd.f32 %v454_v14, %v267_v41  ;;  %v468_v16 = vsub.f32 %v1197_v30, %v454_v14  ;;  %v469_v17 = vsub.f32 %v1199_v31, %v454_v14 }
 0x19e   : > { %v530_v19 = vpop.permute.xlu1 %529 }
 0x19f   : > { %632 = vperm.xlu1 %964, %v598_v15   ;;  %vm484_vm4 = vcmp.ge.f32.partialorder %v468_v16, 0.0  ;;  %vm485_vm5 = vcmp.ge.f32.partialorder %v469_v17, 0.0 }
 0x1a2   : > { %v534_v20 = vpop.permute.xlu1 %533  ;;  %v491_v22 = vpop.permute.xlu0 %490 }
 0x1a3   : > { %v563_v51 = vsel %vm475_vm7, %v496_v18, %v534_v20  ;;  %v560_v52 = vsel %vm472_vm8, %v491_v22, %v530_v19  ;;  %v561_v53 = vsel %vm473_vm9, %v491_v22, %v530_v19 }
 0x1a4   : > { %v579_v58 = vmul.f32 %v563_v51, %v1237_v55  ;;  %v576_v61 = vmul.f32 %v560_v52, %v1228_v49  ;;  %v577_v62 = vmul.f32 %v561_v53, %v1231_v50 }
 0x1a6   : > { %v1265_v24 = vpop.permute.xlu0 %510 }
 0x1a7   : > { %v501_v21 = vpop.permute.xlu1 %500 }
 0x1aa   : > { %v521_v26 = vpop.permute.xlu0 %520 }
 0x1ab   : > { %v506_v23 = vpop.permute.xlu1 %505 }
 0x1af   : > { %v542_v28 = vpop.permute.xlu0 %541 }
 0x1b0   : > { %v538_v25 = vpop.permute.xlu1 %537  ;;  %v566_v55 = vsel %vm478_vm12, %v506_v23, %v542_v28  ;;  %v567_v9 = vsel %vm479_vm13, %v506_v23, %v542_v28 }
 0x1b1   : > { %v564_v49 = vsel %vm476_vm10, %v501_v21, %v538_v25  ;;  %v565_v13 = vsel %vm477_vm11, %v501_v21, %v538_v25  ;;  %v582_v14 = vmul.f32 %v566_v55, %v1246_v0  ;;  %v583_v15 = vmul.f32 %v567_v9, %v1249_v1 }
 0x1b3   : > { %v1269_v35 = vpop.permute.xlu0 %549 }
 0x1b5   : > { %v1267_v27 = vpop.permute.xlu1 %515 }
 0x1b7   : > { %v558_v39 = vpop.permute.xlu0 %557 }
 0x1e7   : > { %v446_v29 = vpop.xlane.xlu1 %445 }
 0x1e8   : > { %v455_v32 = vmul.f32 0.00390625, %v446_v29 }
 0x1ea   : > { %v599_v30 = vadd.f32 %v455_v32, %v1218_v44  ;;  %v470_v31 = vsub.f32 %v1203_v33, %v455_v32  ;;  %v471_v36 = vsub.f32 %v1205_v34, %v455_v32 }
 0x1eb   : > { %v1274_v37 = vpop.permute.xlu1 %545 }
 0x1ec   : > { %637 = vperm.xlu1 %964, %v599_v30   ;;  %vm486_vm2 = vcmp.ge.f32.partialorder %v470_v31, 0.0  ;;  %vm487_vm3 = vcmp.ge.f32.partialorder %v471_v36, 0.0  ;;  %v568_v1 = vsel %vm480_vm14, %v1265_v24, %v1274_v37  ;;  %v569_v23 = vsel %vm481_vm15, %v1265_v24, %v1274_v37 }
 0x1ed   : > { %v584_v32 = vmul.f32 %v568_v1, %v1252_v5  ;;  %v585_v30 = vmul.f32 %v569_v23, %v1255_v6 }
 0x1ef   : > { %v526_v40 = vpop.permute.xlu1 %525 }
 0x1f0   : > { %v574_v41 = vsel %vm486_vm2, %v526_v40, %v558_v39  ;;  %v575_v42 = vsel %vm487_vm3, %v526_v40, %v558_v39  ;;  %965 = vset.pattern.permute.xlu1 %v1035_v11  ;;  %v562_v11 = vsel %vm474_vm6, %v496_v18, %v534_v20  ;;  %vm483_vm2 = vcmp.ge.f32.partialorder %v1261_v12, 0.0 }
 0x1f1   : > { %v1277_v43 = vmul.f32 %v574_v41, %v470_v31  ;;  %v1279_v46 = vmul.f32 %v575_v42, %v471_v36  ;;  %v578_v57 = vmul.f32 %v562_v11, %v1234_v54  ;;  %vm657_vm3 = vcmask 523264  }
 0x1f4   : > { %v554_v33 = vpop.permute.xlu1 %553 }
 0x1f5   : > { %v572_v44 = vsel %vm484_vm4, %v521_v26, %v554_v33  ;;  %v573_v34 = vsel %vm485_vm5, %v521_v26, %v554_v33 }
 0x1f6   : > { %v1281_v47 = vmul.f32 %v572_v44, %v468_v16  ;;  %v1283_v48 = vmul.f32 %v573_v34, %v469_v17  ;;  %v580_v16 = vmul.f32 %v564_v49, %v1240_v59  ;;  %v581_v17 = vmul.f32 %v565_v13, %v1243_v60  ;;  %v656_v44 = vld [vmem:[%s1383_s4] sm:$0xf] }
 0x1f7   : > { %v570_v59 = vsel %vm482_vm1, %v1267_v27, %v1269_v35  ;;  %v571_v60 = vsel %vm483_vm2, %v1267_v27, %v1269_v35  ;;  %v269_v34 = vld [vmem:[%s259_s26] sm:$0xf] }
 0x1f8   : > { %v586_v28 = vmul.f32 %v570_v59, %v1258_v10  ;;  %v587_v29 = vmul.f32 %v571_v60, %v1261_v12  ;;  %744 = vperm.xlu1 %965, %v269_v34  }
 0x1fc   : > { %966 = vset.pattern.permute.xlu1 %v1036_v38 }
 0x1fd   : > { %748 = vperm.xlu1 %966, %v269_v34  }
 0x201   : > { %967 = vset.pattern.permute.xlu1 %v1037_v45 }
 0x206   : > { %v603_v56 = vpop.permute.xlu1 %602 }
 0x207   : > { %v640_v2 = vadd.f32 %v603_v56, %v576_v61  ;;  %v641_v3 = vadd.f32 %v603_v56, %v577_v62 }
 0x20a   : > { %v608_v63 = vpop.permute.xlu1 %607 }
 0x20b   : > { %v642_v4 = vadd.f32 %v608_v63, %v578_v57  ;;  %v643_v7 = vadd.f32 %v608_v63, %v579_v58 }
 0x20d   : > { %v895_v54 = vpack.c.bf16 %v643_v7, %v641_v3  ;;  %v897_v8 = vpack.c.bf16 %v642_v4, %v640_v2 }
 0x20e   : > { %v613_v50 = vpop.permute.xlu1 %612 }
 0x20f   : > { %896 = vmatprep.subr.bf16.mxu1 %v895_v54  ;;  %v644_v19 = vadd.f32 %v613_v50, %v580_v16  ;;  %v645_v20 = vadd.f32 %v613_v50, %v581_v17 }
 0x210   : > { %898 = vmatpush1.bf16.msra.mxu1 %v897_v8 }
 0x212   : > { %v618_v18 = vpop.permute.xlu1 %617 }
 0x213   : > { %v646_v22 = vadd.f32 %v618_v18, %v582_v14  ;;  %v647_v26 = vadd.f32 %v618_v18, %v583_v15 }
 0x215   : > { %v899_v0 = vpack.c.bf16 %v647_v26, %v645_v20  ;;  %v901_v21 = vpack.c.bf16 %v646_v22, %v644_v19 }
 0x216   : > { %v623_v25 = vpop.permute.xlu1 %622 }
 0x217   : > { %900 = vmatprep.subr.bf16.mxu1 %v899_v0  ;;  %v648_v36 = vadd.f32 %v623_v25, %v584_v32  ;;  %v649_v27 = vadd.f32 %v623_v25, %v585_v30 }
 0x218   : > { %902 = vmatpush1.bf16.msra.mxu1 %v901_v21 }
 0x21a   : > { %v628_v31 = vpop.permute.xlu1 %627 }
 0x21b   : > { %v650_v35 = vadd.f32 %v628_v31, %v586_v28  ;;  %v651_v39 = vadd.f32 %v628_v31, %v587_v29 }
 0x21d   : > { %v903_v40 = vpack.c.bf16 %v651_v39, %v649_v27  ;;  %v905_v41 = vpack.c.bf16 %v650_v35, %v648_v36 }
 0x21e   : > { %v633_v24 = vpop.permute.xlu1 %632 }
 0x21f   : > { %904 = vmatprep.subr.bf16.mxu1 %v903_v40  ;;  %v652_v10 = vadd.f32 %v633_v24, %v1281_v47  ;;  %v653_v12 = vadd.f32 %v633_v24, %v1283_v48 }
 0x220   : > { %906 = vmatpush1.bf16.msra.mxu1 %v905_v41 }
 0x26b   : > { %v638_v37 = vpop.permute.xlu1 %637 }
 0x26c   : > { %v654_v5 = vadd.f32 %v638_v37, %v1277_v43  ;;  %v655_v6 = vadd.f32 %v638_v37, %v1279_v46 }
 0x26e   : > { %v907_v42 = vpack.c.bf16 %v655_v6, %v653_v12  ;;  %v909_v33 = vpack.c.bf16 %v654_v5, %v652_v10 }
 0x270   : > { %908 = vmatprep.subr.bf16.mxu1 %v907_v42 }
 0x271   : > { %910 = vmatpush1.bf16.msra.mxu1 %v909_v33 }
 0x274   : > { %886 = vmatmul.mubr.msk.f32.vlgmr.msra.gmra.mrb[0].mxu1 %vm657_vm3, %v656_v44 }
 0x277   : > { %v745_v38 = vpop.permute.xlu1 %744 }
 0x27c   : > { %v749_v45 = vpop.permute.xlu1 %748 }
 0x347   : > { %v727_v43 = vpop.f32.mrb[0].mxu1 }
 0x348   : > { %v732_v46 = vsel %vm305_vm0, %v727_v43, 0.0  ;;  %v729_v47 = vpop.f32.mrb[1].mxu1 }
 0x349   : > { %v733_v48 = vsel %vm305_vm0, %v729_v47, 0.0 }
 0x34a   : > { %v734_v11 = vadd.f32 %v733_v48, %v732_v46 }
 0x34c   : > { %735 = vadd.xlane.f32.xlu0 %v734_v11 }
 0x3d9   : > { %v736_v51 = vpop.xlane.xlu0 %735 }
 0x3da   : > { %v737_v52 = vmul.f32 0.00390625, %v736_v51 }
 0x3dc   : > { %v738_v53 = vsub.f32 %v727_v43, %v737_v52  ;;  %v739_v56 = vsub.f32 %v729_v47, %v737_v52  ;;  %v755_v57 = vadd.f32 %v737_v52, %v269_v34 }
 0x3de   : > { %758 = vperm.xlu1 %967, %v755_v57   ;;  %vm740_vm4 = vcmp.ge.f32.partialorder %v738_v53, 0.0  ;;  %vm741_vm5 = vcmp.ge.f32.partialorder %v739_v56, 0.0 }
 0x3df   : > { %v751_v58 = vsel %vm740_vm4, %v745_v38, %v749_v45  ;;  %v752_v61 = vsel %vm741_vm5, %v745_v38, %v749_v45 }
 0x3e0   : > { %v753_v62 = vmul.f32 %v751_v58, %v738_v53  ;;  %v754_v63 = vmul.f32 %v752_v61, %v739_v56 }
 0x45d   : > { %v759_v2 = vpop.permute.xlu1 %758 }
 0x45e   : > { %v761_v3 = vadd.f32 %v759_v2, %v753_v62  ;;  %v762_v4 = vadd.f32 %v759_v2, %v754_v63 }
 0x460   : > { %v765_v7 = vcombine.low %v761_v3, %v762_v4 }
 0x462   : > { %767 = vst [vmem:[%s245_s8] sm:$0xff] %v765_v7 }
 0x463   : > { %983 = shalt.err (!%p980_p3)
}
 0x464   : > { %s984_s17 = scalar_lea.hbm %s1337_s12, 128  ;;  %s988_s26 = scalar_lea.hbm %s1384_s5, 256 }
 0x465   : > { %p985_p4 = scmp.ne.s32.totalorder %s1337_s12, %s984_s17  ;;  %p989_p9 = scmp.lt.u32.totalorder %s1337_s12, %s1384_s5 }
 0x466   : > { %p990_p10 = scmp.lt.u32.totalorder %s988_s26, %s984_s17  ;;  %p992_p12 = scmp.lt.u32.totalorder %s984_s17, %s1337_s12 }
 0x467   : > { %p986_p7 = pnand %p985_p4, %p1107_p5 }
 0x468   : > { %p991_p11 = por %p990_p10, %p989_p9 }
 0x469   : > { %p987_p8 = pneg %p986_p7 }
 0x46a   : > { %p993_p13 = por %p992_p12, %p991_p11 }
 0x46c   : > { %p994_p0 = pnand %p993_p13, %p987_p8 }
 0x46e   : > { %997 = shalt.err (!%p994_p0)
}
 0x46f   : > { %911 = dma.vmem_to_hbm [thread:$0]  (%p1107_p5), %s1339_s9, 128, %s1337_s12, %s769_s13  }
 0x470 PF: > { %p917_p1 = scmp.ge.s32.totalorder %s1032_s21, 2  ;;  %s795_s7 = sand.u32 1, %s1020_s18  }
 0x471   : > { %s796_s8 = scalar_lea.sflag [#allocation3], %s795_s7 }
 0x472   : > { %p914_p2 = pnand %p917_p1, %p1111_p6 }
 0x474   : > { %1015 = dma.done.wait (!%p914_p2), %s796_s8, 128  }
 0x475   : > { %1017 = vsyncadd (!%p914_p2), %s796_s8, 4294967168  ;;  %p15_p3 = scmp.ge.s32.totalorder %s1094_s24, 4   ;;  %s1387_s18 = smov %s1024_s19 }
 0x476   : > { %s1388_s19 = smov %s1028_s20  ;;  %s1389_s20 = smov %s1105_s27 }
 0x477   : > { %s1390_s21 = smov %s1094_s24  ;;  %17 = sbr.rel (!%p15_p3) target bundleno = 3 (0x3), region = 81 }
 0x47e   :  { %801 = vsyncpa [#allocation3], 1 }
 0x47f   :  { %803 = vsyncpa [#allocation3 + $0x1], 1 }

</bundles_post_ra>
